<compile_context>
chip_gen: v7x
topology: tpu7x:2x2x1
jax: 0.10.0
libtpu: 0.0.40
codegen_flags: <defaults>
</compile_context>

<pallas_src>
import jax
import jax.numpy as jnp
from jax import lax
from jax.experimental import pallas as pl
from jax.experimental.pallas import tpu as pltpu


def _round_up(n, m):
    return ((n + m - 1) // m) * m


def _logistic_kernel(w_ref, b_ref, x_ref, labels_ref, wsel_ref,
                     pred_ref, wloss_ref):
    """One batch tile.

    w_ref:      (1, H)   linear weight (lane-dense over H)
    b_ref:      (1,)     bias scalar in SMEM
    x_ref:      (TB, H)  input tile
    labels_ref: (1, TB)  labels, lane-dense over batch
    wsel_ref:   (1, TB)  per-sample causal weights (0 for padded rows)
    pred_ref:   (2, TB)  row 0 = 1 - sigmoid, row 1 = sigmoid
    wloss_ref:  (1, TB)  per-sample weighted NLL (summed in the wrapper)
    """
    w = w_ref[...]                              # (1, H)
    x = x_ref[...]                              # (TB, H)
    b = b_ref[0]                                # scalar bias

    # (1,H) contracted with (TB,H) over H -> (1,TB): batch on the lane axis.
    z = lax.dot_general(
        w, x,
        dimension_numbers=(((1,), (1,)), ((), ())),
        preferred_element_type=jnp.float32) + b              # (1, TB)

    p1 = 1.0 / (1.0 + jnp.exp(-z))                            # sigmoid
    p0 = 1.0 - p1
    # Single lane-dense (2, TB) store.
    pred_ref[...] = jnp.concatenate([p0, p1], axis=0)

    labels = labels_ref[...]                                  # (1, TB)
    wsel = wsel_ref[...]                                      # (1, TB)
    # Stable BCE-with-logits:  softplus(z) - labels * z
    softplus = jnp.maximum(z, 0.0) + jnp.log(1.0 + jnp.exp(-jnp.abs(z)))
    wloss_ref[...] = wsel * (softplus - labels * z)


def _run_kernel(x, weight, bias, labels, w_selected, *, tile_b=2048):
    """x: (B,H), weight: (1,H), bias: (1,), labels: (B,), w_selected: (B,)."""
    B, H = x.shape
    x = x.astype(jnp.float32)
    weight2 = weight.astype(jnp.float32).reshape(1, H)
    bias1 = bias.astype(jnp.float32).reshape(1)
    labels2 = labels.astype(jnp.float32).reshape(1, B)
    wsel2 = w_selected.astype(jnp.float32).reshape(1, B)

    # Batch tile: lane-aligned (multiple of 128) and small enough that a
    # double-buffered x tile stays well under v7x's 64 MiB physical VMEM.
    bytes_per_row = H * 4
    vmem_rows = max(128, ((8 * 1024 * 1024) // bytes_per_row) // 128 * 128)
    tb = min(tile_b, vmem_rows, _round_up(B, 128))
    tb = max(128, (tb // 128) * 128)

    b_pad = _round_up(B, tb)
    if b_pad != B:
        pad = b_pad - B
        x = jnp.pad(x, ((0, pad), (0, 0)))
        labels2 = jnp.pad(labels2, ((0, 0), (0, pad)))
        wsel2 = jnp.pad(wsel2, ((0, 0), (0, pad)))   # zero weight -> zero loss
    grid = (b_pad // tb,)

    pred_t, wloss = pl.pallas_call(
        _logistic_kernel,
        grid=grid,
        in_specs=[
            pl.BlockSpec((1, H), lambda i: (0, 0)),                # weight
            pl.BlockSpec(memory_space=pltpu.MemorySpace.SMEM),     # bias
            pl.BlockSpec((tb, H), lambda i: (i, 0)),               # x
            pl.BlockSpec((1, tb), lambda i: (0, i)),               # labels
            pl.BlockSpec((1, tb), lambda i: (0, i)),               # w_selected
        ],
        out_specs=(
            pl.BlockSpec((2, tb), lambda i: (0, i)),               # prediction
            pl.BlockSpec((1, tb), lambda i: (0, i)),               # weighted NLL
        ),
        out_shape=(
            jax.ShapeDtypeStruct((2, b_pad), jnp.float32),
            jax.ShapeDtypeStruct((1, b_pad), jnp.float32),
        ),
        compiler_params=pltpu.CompilerParams(
            dimension_semantics=("parallel",),   # per-block outputs: shardable
            vmem_limit_bytes=32 * 1024 * 1024,
        ),
    )(weight2, bias1, x, labels2, wsel2)

    return pred_t[:, :B], wloss[:, :B]


def vector_logistic_forward(x, x_indexes, labels, weight, bias,
                            causal_w, lambdas, mode="train"):
    """JAX/Pallas re-implementation of Vector_LogisticNet_Classifier.forward."""
    lambda3 = lambdas[3]
    lambda4 = lambdas[4]
    B = x.shape[0]

    if mode == "train":
        W = causal_w * causal_w
        w_selected = jnp.take(W, x_indexes, axis=0)   # torch.gather(W, 0, idx)
    else:  # eval: unweighted NLL sum
        w_selected = jnp.ones((B,), dtype=jnp.float32)

    pred_t, wloss = _run_kernel(x, weight, bias, labels, w_selected)
    pred = pred_t.T                                  # (B, 2): [1-p, p]
    part1 = jnp.sum(wloss)

    # O(H) parameter penalties: cheap, done outside the hot kernel.
    L1 = jnp.sum(jnp.abs(weight)) + jnp.sum(jnp.abs(bias))
    L2 = jnp.sum(weight * weight) + jnp.sum(bias * bias)
    loss = part1 + lambda3 * L2 + lambda4 * L1

    if mode == "train":
        return {
            "loss": loss,
            "loss_detail": jnp.stack([part1, lambda3 * L2, lambda4 * L1]),
            "prediction": jnp.argmax(pred, axis=1),
            "pred_orign": pred,
        }
    else:
        return {"prediction": jnp.argmax(pred, axis=1), "loss": loss}


if __name__ == "__main__":
    hidden_size = 32
    num_labels = 1          # logistic head: prediction has 2 columns after cat
    batch = 8
    pool = 16               # size of the causal sample-weight vector w

    key = jax.random.PRNGKey(0)
    kx, kw, kb, kl, kwvec, kidx = jax.random.split(key, 6)

    # deterministic parameter init (torch.nn.Linear-like uniform bound)
    bound = 1.0 / jnp.sqrt(jnp.float32(hidden_size))
    weight = jax.random.uniform(kw, (num_labels, hidden_size),
                                minval=-bound, maxval=bound, dtype=jnp.float32)
    bias = jax.random.uniform(kb, (num_labels,),
                              minval=-bound, maxval=bound, dtype=jnp.float32)

    # inputs
    x = jax.random.normal(kx, (batch, hidden_size), dtype=jnp.float32)
    labels = jax.random.bernoulli(kl, 0.5, (batch,)).astype(jnp.float32)
    x_indexes = jax.random.randint(kidx, (batch,), 0, pool, dtype=jnp.int32)

    # causal hyperparameters (set_causal_hyperparameter)
    causal_w = jax.random.uniform(kwvec, (pool,), minval=0.5, maxval=1.5,
                                  dtype=jnp.float32)
    lambdas = jnp.array([0.0, 0.0, 0.0, 0.01, 0.001], dtype=jnp.float32)

    out = vector_logistic_forward(x, x_indexes, labels, weight, bias,
                                  causal_w, lambdas, mode="train")
    jax.block_until_ready(out["loss"])
    jax.block_until_ready(out["pred_orign"])

    out_eval = vector_logistic_forward(x, x_indexes, labels, weight, bias,
                                       causal_w, lambdas, mode="eval")
    jax.block_until_ready(out_eval["loss"])

    # pure-JAX reference (mirrors the torch forward)
    z_ref = x @ weight.T + bias                        # (B, 1)
    p1_ref = 1.0 / (1.0 + jnp.exp(-z_ref))
    p0_ref = 1.0 - p1_ref
    pred_ref = jnp.concatenate([p0_ref, p1_ref], axis=1)
    W_ref = causal_w * causal_w
    Wsel_ref = jnp.take(W_ref, x_indexes, axis=0)
    nll_ref = -(labels * jnp.log(p1_ref[:, 0]) +
                (1.0 - labels) * jnp.log(p0_ref[:, 0]))
    part1_ref = jnp.sum(Wsel_ref * nll_ref)
    L1_ref = jnp.sum(jnp.abs(weight)) + jnp.sum(jnp.abs(bias))
    L2_ref = jnp.sum(weight ** 2) + jnp.sum(bias ** 2)
    loss_ref = part1_ref + lambdas[3] * L2_ref + lambdas[4] * L1_ref

    assert bool(jnp.isfinite(out["loss"]))
    assert out["pred_orign"].shape == (batch, 2)
    assert bool(jnp.allclose(out["pred_orign"], pred_ref, rtol=1e-4, atol=1e-5))
    assert bool(jnp.allclose(out["loss"], loss_ref, rtol=1e-4, atol=1e-5))
    assert bool(jnp.isfinite(out_eval["loss"]))

    print("KERNEL_OK")
</pallas_src>

<mosaic_0001>
module attributes {stable_mosaic.version = 11 : i64} {
  func.func @_logistic_kernel(%arg0: i32, %arg1: memref<1x32xf32, #tpu.memory_space<vmem>>, %arg2: memref<1xf32, #tpu.memory_space<smem>>, %arg3: memref<128x32xf32, #tpu.memory_space<vmem>>, %arg4: memref<1x128xf32, #tpu.memory_space<vmem>>, %arg5: memref<1x128xf32, #tpu.memory_space<vmem>>, %arg6: memref<2x128xf32, #tpu.memory_space<vmem>>, %arg7: memref<1x128xf32, #tpu.memory_space<vmem>>) attributes {dimension_semantics = [#tpu.dimension_semantics<parallel>], iteration_bounds = array<i64: 1>, scalar_prefetch = 0 : i64, scratch_operands = 0 : i64, tpu.core_type = #tpu.core_type<tc>, window_params = [{pipeline_mode = #tpu.pipeline_mode<synchronous>, transform_indices = @transform_0, window_bounds = array<i64: 1, 32>}, {transform_indices = @transform_1, window_bounds = array<i64: 1>}, {transform_indices = @transform_2, window_bounds = array<i64: 128, 32>}, {transform_indices = @transform_3, window_bounds = array<i64: 1, 128>}, {transform_indices = @transform_4, window_bounds = array<i64: 1, 128>}, {transform_indices = @transform_5, window_bounds = array<i64: 2, 128>}, {transform_indices = @transform_6, window_bounds = array<i64: 1, 128>}]} {
    %c0 = arith.constant 0 : index
    %c0_0 = arith.constant 0 : index
    %0 = vector.load %arg1[%c0, %c0_0] : memref<1x32xf32, #tpu.memory_space<vmem>>, vector<1x32xf32>
    %c0_1 = arith.constant 0 : index
    %c0_2 = arith.constant 0 : index
    %1 = vector.load %arg3[%c0_1, %c0_2] : memref<128x32xf32, #tpu.memory_space<vmem>>, vector<128x32xf32>
    %c0_3 = arith.constant 0 : index
    %2 = memref.load %arg2[%c0_3] : memref<1xf32, #tpu.memory_space<smem>>
    %cst = arith.constant dense<0.000000e+00> : vector<1x128xf32>
    %3 = tpu.matmul %0, %1, %cst {dimension_numbers = #tpu.dot_dimension_numbers<[1], [1], [0], [0], [0, 0, 1, 0], [], []>} : vector<1x32xf32>, vector<128x32xf32>, vector<1x128xf32> -> vector<1x128xf32>
    %4 = vector.broadcast %2 : f32 to vector<1x128xf32>
    %5 = arith.addf %3, %4 : vector<1x128xf32>
    %cst_4 = arith.constant 0.000000e+00 : f32
    %6 = vector.broadcast %cst_4 : f32 to vector<1x128xf32>
    %7 = arith.subf %6, %5 : vector<1x128xf32>
    %8 = math.exp %7 : vector<1x128xf32>
    %cst_5 = arith.constant 1.000000e+00 : f32
    %9 = vector.broadcast %cst_5 : f32 to vector<1x128xf32>
    %10 = arith.addf %9, %8 : vector<1x128xf32>
    %cst_6 = arith.constant 1.000000e+00 : f32
    %11 = vector.broadcast %cst_6 : f32 to vector<1x128xf32>
    %12 = arith.divf %11, %10 : vector<1x128xf32>
    %cst_7 = arith.constant 1.000000e+00 : f32
    %13 = vector.broadcast %cst_7 : f32 to vector<1x128xf32>
    %14 = arith.subf %13, %12 : vector<1x128xf32>
    %15 = tpu.concatenate %14, %12 in 0 : vector<1x128xf32>, vector<1x128xf32> -> vector<2x128xf32>
    %c0_8 = arith.constant 0 : index
    %c0_9 = arith.constant 0 : index
    %16 = vector.load %arg6[%c0_8, %c0_9] : memref<2x128xf32, #tpu.memory_space<vmem>>, vector<2x128xf32>
    tpu.vector_store %arg6[%c0_8, %c0_9], %15 {strides = array<i32>} : memref<2x128xf32, #tpu.memory_space<vmem>>, vector<2x128xf32>,
    %c0_10 = arith.constant 0 : index
    %c0_11 = arith.constant 0 : index
    %17 = vector.load %arg4[%c0_10, %c0_11] : memref<1x128xf32, #tpu.memory_space<vmem>>, vector<1x128xf32>
    %c0_12 = arith.constant 0 : index
    %c0_13 = arith.constant 0 : index
    %18 = vector.load %arg5[%c0_12, %c0_13] : memref<1x128xf32, #tpu.memory_space<vmem>>, vector<1x128xf32>
    %cst_14 = arith.constant 0.000000e+00 : f32
    %19 = vector.broadcast %cst_14 : f32 to vector<1x128xf32>
    %20 = arith.maximumf %5, %19 : vector<1x128xf32>
    %21 = math.absf %5 : vector<1x128xf32>
    %cst_15 = arith.constant 0.000000e+00 : f32
    %22 = vector.broadcast %cst_15 : f32 to vector<1x128xf32>
    %23 = arith.subf %22, %21 : vector<1x128xf32>
    %24 = math.exp %23 : vector<1x128xf32>
    %cst_16 = arith.constant 1.000000e+00 : f32
    %25 = vector.broadcast %cst_16 : f32 to vector<1x128xf32>
    %26 = arith.addf %25, %24 : vector<1x128xf32>
    %27 = math.log %26 : vector<1x128xf32>
    %28 = arith.addf %20, %27 : vector<1x128xf32>
    %29 = arith.mulf %17, %5 : vector<1x128xf32>
    %30 = arith.subf %28, %29 : vector<1x128xf32>
    %31 = arith.mulf %18, %30 : vector<1x128xf32>
    %c0_17 = arith.constant 0 : index
    %c0_18 = arith.constant 0 : index
    %32 = vector.load %arg7[%c0_17, %c0_18] : memref<1x128xf32, #tpu.memory_space<vmem>>, vector<1x128xf32>
    tpu.vector_store %arg7[%c0_17, %c0_18], %31 {strides = array<i32>} : memref<1x128xf32, #tpu.memory_space<vmem>>, vector<1x128xf32>,
    return
  }
  func.func @transform_0(%arg0: i32) -> (i32, i32) {
    %c0_i32 = arith.constant 0 : i32
    %c0_i32_0 = arith.constant 0 : i32
    %c0_i32_1 = arith.constant 0 : i32
    return %c0_i32, %c0_i32_0 : i32, i32
  }
  func.func @transform_1(%arg0: i32) -> i32 {
    %c0_i32 = arith.constant 0 : i32
    %c0_i32_0 = arith.constant 0 : i32
    return %c0_i32 : i32
  }
  func.func @transform_2(%arg0: i32) -> (i32, i32) {
    %c0_i32 = arith.constant 0 : i32
    %c0_i32_0 = arith.constant 0 : i32
    return %arg0, %c0_i32 : i32, i32
  }
  func.func @transform_3(%arg0: i32) -> (i32, i32) {
    %c0_i32 = arith.constant 0 : i32
    %c0_i32_0 = arith.constant 0 : i32
    return %c0_i32, %arg0 : i32, i32
  }
  func.func @transform_4(%arg0: i32) -> (i32, i32) {
    %c0_i32 = arith.constant 0 : i32
    %c0_i32_0 = arith.constant 0 : i32
    return %c0_i32, %arg0 : i32, i32
  }
  func.func @transform_5(%arg0: i32) -> (i32, i32) {
    %c0_i32 = arith.constant 0 : i32
    %c0_i32_0 = arith.constant 0 : i32
    return %c0_i32, %arg0 : i32, i32
  }
  func.func @transform_6(%arg0: i32) -> (i32, i32) {
    %c0_i32 = arith.constant 0 : i32
    %c0_i32_0 = arith.constant 0 : i32
    return %c0_i32, %arg0 : i32, i32
  }
}

</mosaic_0001>

<bundles_post_ra>
// kernel: tpu_custom_call.1
= control target key start
LH: loop header
LB: loop body
LE: loop exit
PB: predicated region body
PF: predicated region fallthrough
CT: control target
= control target key end

     0   :  { %13 = vsyncpa [#allocation4], 0  ;;  %vm44_vm0 = vcmask 261120   ;;  %v384_v2 = vmov 0.0|0.0   ;;  %vm385_vm2 = vmmov 0   ;;  %v386_v5 = vmov 0.0   ;;  %s531_s0 = inlined_call_operand.vmem [shape: f32[1,32], index: 0, kind: input, shape index: {}]   ;;  %s532_s1 = inlined_call_operand.<no memory space> [shape: f32[1], index: 1, kind: input, shape index: {}]   ;;  %s533_s2 = inlined_call_operand.vmem [shape: f32[128,32], index: 2, kind: input, shape index: {}]   ;;  %s534_s3 = inlined_call_operand.vmem [shape: f32[1,128], index: 3, kind: input, shape index: {}]   ;;  %s535_s4 = inlined_call_operand.vmem [shape: f32[1,128], index: 4, kind: input, shape index: {}]   ;;  %s536_s5 = inlined_call_operand.hbm [shape: f32[2,128], index: 5, kind: output, shape index: {0}]   ;;  %s537_s6 = inlined_call_operand.hbm [shape: f32[1,128], index: 6, kind: output, shape index: {1}]  }
   0x1   :  { %v26_v0 = vld [vmem:[%s533_s2] sm:$0xff]  ;;  %v27_v1 = vld [vmem:[%s533_s2 + $0x8] sm:$0xff]  ;;  %291 = vmatprep.subr.bf16.mxu0 %v384_v2  ;;  %vm432_vm1 = vmpackc.low %vm44_vm0, %vm44_vm0  ;;  %288 = vmatprep.mubr.msk.f32.mxu0 %vm385_vm2, %v386_v5 }
   0x2   :  { %v292_v3 = vpack.c.bf16 %v27_v1, %v26_v0  ;;  %v28_v6 = vld [vmem:[%s533_s2 + $0x10] sm:$0xff]  ;;  %v29_v7 = vld [vmem:[%s533_s2 + $0x18] sm:$0xff] }
   0x4   :  { %294 = vmatpush3.bf16.xpose.msk.msra.mxu0 %vm432_vm1, %v292_v3 }
   0x5   :  { %295 = vmatprep.subr.bf16.mxu0 %v384_v2 }
   0x6   :  { %14 = vsyncpa [#allocation6], 0  ;;  %v296_v8 = vpack.c.bf16 %v29_v7, %v28_v6  ;;  %v30_v9 = vld [vmem:[%s533_s2 + $0x20] sm:$0xff]  ;;  %v31_v10 = vld [vmem:[%s533_s2 + $0x28] sm:$0xff]  ;;  %v43_v28 = vstv %s532_s1  ;;  %vm176_vm3 = vcmask 1040384  }
   0x7   :  { %v300_v11 = vpack.c.bf16 %v31_v10, %v30_v9  ;;  %v32_v12 = vld [vmem:[%s533_s2 + $0x30] sm:$0xff]  ;;  %v33_v13 = vld [vmem:[%s533_s2 + $0x38] sm:$0xff]  ;;  %v34_v15 = vld [vmem:[%s533_s2 + $0x40] sm:$0xff] }
   0x8   :  { %v304_v14 = vpack.c.bf16 %v33_v13, %v32_v12  ;;  %v35_v16 = vld [vmem:[%s533_s2 + $0x48] sm:$0xff]  ;;  %v36_v18 = vld [vmem:[%s533_s2 + $0x50] sm:$0xff]  ;;  %v37_v19 = vld [vmem:[%s533_s2 + $0x58] sm:$0xff] }
   0x9   :  { %v308_v17 = vpack.c.bf16 %v35_v16, %v34_v15  ;;  %v312_v20 = vpack.c.bf16 %v37_v19, %v36_v18  ;;  %v38_v21 = vld [vmem:[%s533_s2 + $0x60] sm:$0xff]  ;;  %v39_v22 = vld [vmem:[%s533_s2 + $0x68] sm:$0xff]  ;;  %v40_v24 = vld [vmem:[%s533_s2 + $0x70] sm:$0xff] }
   0xa   :  { %v316_v23 = vpack.c.bf16 %v39_v22, %v38_v21  ;;  %v41_v25 = vld [vmem:[%s533_s2 + $0x78] sm:$0xff]  ;;  %v25_v27 = vld [vmem:[%s531_s0] sm:$0x1]  ;;  %s387_s0 = smov [#allocation3]  }
   0xb   :  { %v320_v26 = vpack.c.bf16 %v41_v25, %v40_v24  ;;  %s200_s2 = sshll.u32 %s387_s0, 4  ;;  %v179_v45 = vld [vmem:[%s534_s3] sm:$0x1]  ;;  %s201_s2 = int_to_ptr.vmem [resolvable:$true] %s200_s2 }
   0xc   :  { %298 = vmatpush3.bf16.xpose.msk.msra.mxu0 %vm432_vm1, %v296_v8  ;;  %s336_s10 = scalar_lea.vmem %s201_s2, 32  ;;  %p341_p1 = scmp.lt.s32.totalorder %s201_s2, %s201_s2 }
   0xd   :  { %299 = vmatprep.subr.bf16.mxu0 %v384_v2  ;;  %p337_p0 = scmp.ne.s32.totalorder %s201_s2, %s336_s10  ;;  %p342_p2 = scmp.lt.s32.totalorder %s336_s10, %s336_s10 }
   0xf   :  { %p343_p3 = por %p342_p2, %p341_p1 }
  0x11   :  { %p344_p4 = pnand %p343_p3, %p337_p0 }
  0x14   :  { %302 = vmatpush3.bf16.xpose.msk.msra.mxu0 %vm432_vm1, %v300_v11 }
  0x15   :  { %303 = vmatprep.subr.bf16.mxu0 %v384_v2 }
  0x1c   :  { %306 = vmatpush3.bf16.xpose.msk.msra.mxu0 %vm432_vm1, %v304_v14 }
  0x1d   :  { %307 = vmatprep.subr.bf16.mxu0 %v384_v2 }
  0x24   :  { %310 = vmatpush3.bf16.xpose.msk.msra.mxu0 %vm432_vm1, %v308_v17 }
  0x25   :  { %311 = vmatprep.subr.bf16.mxu0 %v384_v2 }
  0x2c   :  { %314 = vmatpush3.bf16.xpose.msk.msra.mxu0 %vm432_vm1, %v312_v20 }
  0x2d   :  { %315 = vmatprep.subr.bf16.mxu0 %v384_v2 }
  0x34   :  { %318 = vmatpush3.bf16.xpose.msk.msra.mxu0 %vm432_vm1, %v316_v23 }
  0x35   :  { %319 = vmatprep.subr.bf16.mxu0 %v384_v2 }
  0x3c   :  { %322 = vmatpush3.bf16.xpose.msk.msra.mxu0 %vm432_vm1, %v320_v26 }
  0x43   :  { %289 = vmatmul.mubr.msk.f32.vlgmr.msra.gmra.mrb[0].mxu0 %vm44_vm0, %v25_v27 }
 0x116   :  { %v162_v29 = vpop.f32.mrb[0].mxu0 }
 0x117   :  { %v163_v30 = vadd.f32 %v162_v29, %v43_v28  ;;  %v290_v31 = vpop.f32.mrb[1].mxu0 }
 0x119   :  { %v166_v32 = vsub.f32 0.0, %v163_v30  ;;  %v182_v33 = vand.u32 2147483647, %v163_v30  ;;  %v181_v47 = vmax.f32 %v163_v30, 0.0 }
 0x11b   :  { %v167_v34 = vmul.f32 1.442695, %v166_v32  ;;  %v183_v35 = vsub.f32 0.0, %v182_v33 }
 0x11d   :  { %328 = vpow2.f32 %v167_v34  ;;  %v184_v36 = vmul.f32 1.442695, %v183_v35 }
 0x11f   :  { %330 = vpow2.f32 %v184_v36 }
 0x127   :  { %v329_v37 = vpop.eup %328 }
 0x128   :  { %v169_v38 = vadd.f32 1.0, %v329_v37 }
 0x129   :  { %v331_v39 = vpop.eup %330 }
 0x12a   :  { %332 = vrcp.f32 %v169_v38  ;;  %v186_v40 = vadd.f32 1.0, %v331_v39 }
 0x12c   :  { %334 = vlog2.f32 %v186_v40 }
 0x134   :  { %v333_v41 = vpop.eup %332 }
 0x135   :  { %v172_v42 = vsub.f32 1.0, %v333_v41  ;;  %v174_v43 = vrot.slane %v333_v41, 7 }
 0x136   :  { %v335_v44 = vpop.eup %334 }
 0x137   :  { %v177_v46 = vsel %vm176_vm3, %v172_v42, %v174_v43  ;;  %v188_v48 = vmul.f32 0.6931472, %v335_v44 }
 0x138   :  { %178 = vst [vmem:[#allocation3] sm:$0x3] %v177_v46 }
 0x139   :  { %347 = shalt.err (!%p344_p4)
}
 0x13a   :  { %s348_s13 = scalar_lea.hbm %s536_s5, 32 }
 0x13b   :  { %p349_p5 = scmp.ne.s32.totalorder %s536_s5, %s348_s13  ;;  %p352_p6 = scmp.lt.u32.totalorder %s348_s13, %s536_s5 }
 0x13d   :  { %p354_p7 = pnand %p352_p6, %p349_p5 }
 0x13f   :  { %357 = shalt.err (!%p354_p7)
}
 0x140   :  { %203 = dma.vmem_to_hbm [thread:$0]  %s201_s2, 32, %s536_s5, [#allocation4]   ;;  %v189_v49 = vadd.f32 %v188_v48, %v181_v47  ;;  %v190_v50 = vmul.f32 %v179_v45, %v163_v30  ;;  %v180_v51 = vld [vmem:[%s535_s4] sm:$0x1] }
 0x141   :  { %s388_s21 = smov [#allocation5]  }
 0x142   :  { %s210_s22 = sshll.u32 %s388_s21, 4  ;;  %v191_v52 = vsub.f32 %v189_v49, %v190_v50  ;;  %s211_s22 = int_to_ptr.vmem [resolvable:$true] %s210_s22 }
 0x143   :  { %s358_s23 = scalar_lea.vmem %s211_s22, 16  ;;  %s362_s24 = scalar_lea.vmem %s211_s22, 32 }
 0x144   :  { %v192_v53 = vmul.f32 %v191_v52, %v180_v51  ;;  %p359_p8 = scmp.ne.s32.totalorder %s211_s22, %s358_s23  ;;  %p363_p9 = scmp.lt.s32.totalorder %s211_s22, %s211_s22 }
 0x145   :  { %p364_p10 = scmp.lt.s32.totalorder %s362_s24, %s358_s23 }
 0x146   :  { %193 = vst [vmem:[#allocation5] sm:$0x1] %v192_v53 }
 0x147   :  { %p365_p11 = por %p364_p10, %p363_p9 }
 0x149   :  { %p366_p12 = pnand %p365_p11, %p359_p8 }
 0x14b   :  { %369 = shalt.err (!%p366_p12)
}
 0x14c   :  { %s370_s26 = scalar_lea.hbm %s537_s6, 16 }
 0x14d   :  { %p371_p13 = scmp.ne.s32.totalorder %s537_s6, %s370_s26  ;;  %p374_p0 = scmp.lt.u32.totalorder %s370_s26, %s537_s6 }
 0x14f   :  { %p376_p1 = pnand %p374_p0, %p371_p13 }
 0x151   :  { %379 = shalt.err (!%p376_p1)
}
 0x152   :  { %213 = dma.vmem_to_hbm [thread:$0]  %s211_s22, 16, %s537_s6, [#allocation6]  }
 0x153   :  { %380 = dma.done.wait [#allocation4], 32  }
 0x154   :  { %381 = vsyncadd [#allocation4], 4294967264 }
 0x155   :  { %382 = dma.done.wait [#allocation6], 16  }
 0x156   :  { %383 = vsyncadd [#allocation6], 4294967280 }
 0x157   :  { %220 = vsyncpa [#allocation4], 1 }
 0x158   :  { %221 = vsyncpa [#allocation6], 1 }

</bundles_post_ra>
